<compile_context>
chip_gen: v6e
topology: v6e:2x2x1
jax: 0.10.0
libtpu: 0.0.40
codegen_flags: <defaults>
</compile_context>

<pallas_src>
import functools

import jax
import jax.numpy as jnp
from jax.experimental import pallas as pl
from jax.experimental.pallas import tpu as pltpu


# ----------------------------------------------------------------------------
# Tiling constants / helpers
# ----------------------------------------------------------------------------
_LANE = 128          # lane width: feature dims padded to multiples of this
_TILE_NODES = 256    # TM == TK: node-row and contraction tile (MXU 256-aligned)
_VMEM_LIMIT = 32 * 1024 * 1024  # safe on v5e / v6e / v7x; tiles use <1 MiB


def _round_up(x, m):
    return ((x + m - 1) // m) * m


def _pad2(a, rows, cols):
    r, c = a.shape
    return jnp.pad(a, ((0, rows - r), (0, cols - c)))


# ----------------------------------------------------------------------------
# Kernel 1: feature transform  XW = X @ W   (row-tiled, bf16 in, bf16 out)
# ----------------------------------------------------------------------------
def _xw_kernel(x_ref, w_ref, o_ref):
    o_ref[...] = jnp.dot(
        x_ref[...], w_ref[...], preferred_element_type=jnp.float32
    ).astype(o_ref.dtype)


def feature_transform(x_bf16, w_bf16, *, tm):
    """[Np, Fin_p] @ [Fin_p, Fout_p] -> [Np, Fout_p] bf16 (padded dims)."""
    n_p, f_in_p = x_bf16.shape
    f_out_p = w_bf16.shape[1]
    return pl.pallas_call(
        _xw_kernel,
        out_shape=jax.ShapeDtypeStruct((n_p, f_out_p), jnp.bfloat16),
        grid_spec=pltpu.PrefetchScalarGridSpec(
            num_scalar_prefetch=0,
            grid=(n_p // tm,),
            in_specs=[
                pl.BlockSpec((tm, f_in_p), lambda i: (i, 0)),
                pl.BlockSpec((f_in_p, f_out_p), lambda i: (0, 0)),
            ],
            out_specs=pl.BlockSpec((tm, f_out_p), lambda i: (i, 0)),
        ),
        compiler_params=pltpu.CompilerParams(
            dimension_semantics=("parallel",),
            vmem_limit_bytes=_VMEM_LIMIT,
        ),
    )(x_bf16, w_bf16)


# ----------------------------------------------------------------------------
# Kernel 2: aggregation  out = act(A @ XW + b)   (tiled i,j,k + accumulator)
# ----------------------------------------------------------------------------
def _agg_kernel(a_ref, xw_ref, b_ref, o_ref, acc_ref, *, apply_relu):
    k = pl.program_id(2)

    @pl.when(k == 0)
    def _init():
        acc_ref[...] = jnp.zeros_like(acc_ref)

    # Pure MXU work in the inner K loop.
    acc_ref[...] += jnp.dot(
        a_ref[...], xw_ref[...], preferred_element_type=jnp.float32
    )

    @pl.when(k == pl.num_programs(2) - 1)
    def _finalize():
        out = acc_ref[...] + b_ref[...]          # bias broadcast (VPU, once)
        if apply_relu:
            out = jnp.maximum(out, 0.0)
        o_ref[...] = out.astype(o_ref.dtype)


def aggregate(a_bf16, xw_bf16, b_f32, *, apply_relu, out_dtype, tm, tk, tn):
    """[Np, Np] @ [Np, Fout_p] + b, optional ReLU.  All dims pre-padded."""
    n_p = a_bf16.shape[0]
    f_out_p = xw_bf16.shape[1]
    grid = (n_p // tm, f_out_p // tn, n_p // tk)
    kernel = functools.partial(_agg_kernel, apply_relu=apply_relu)
    return pl.pallas_call(
        kernel,
        out_shape=jax.ShapeDtypeStruct((n_p, f_out_p), out_dtype),
        grid_spec=pltpu.PrefetchScalarGridSpec(
            num_scalar_prefetch=0,
            grid=grid,
            in_specs=[
                pl.BlockSpec((tm, tk), lambda i, j, k: (i, k)),   # A tile
                pl.BlockSpec((tk, tn), lambda i, j, k: (k, j)),   # XW tile
                pl.BlockSpec((1, tn), lambda i, j, k: (0, j)),    # bias tile
            ],
            out_specs=pl.BlockSpec((tm, tn), lambda i, j, k: (i, j)),
            scratch_shapes=[pltpu.VMEM((tm, tn), jnp.float32)],
        ),
        compiler_params=pltpu.CompilerParams(
            dimension_semantics=("parallel", "parallel", "arbitrary"),
            vmem_limit_bytes=_VMEM_LIMIT,
        ),
    )(a_bf16, xw_bf16, b_f32)


# ----------------------------------------------------------------------------
# The wrapped "model": a 2-layer GCN, parameters built deterministically.
# ----------------------------------------------------------------------------
class GCNModel:
    def __init__(self, f_in, hidden, f_out, key):
        k1, k2 = jax.random.split(key)
        scale1 = 1.0 / jnp.sqrt(jnp.float32(f_in))
        scale2 = 1.0 / jnp.sqrt(jnp.float32(hidden))
        w1 = jax.random.normal(k1, (f_in, hidden), jnp.float32) * scale1
        b1 = jnp.zeros((1, hidden), jnp.float32)
        w2 = jax.random.normal(k2, (hidden, f_out), jnp.float32) * scale2
        b2 = jnp.zeros((1, f_out), jnp.float32)

        # Unpadded f32 copies (for the reference check).
        self.w1_f32, self.b1_f32 = w1, b1
        self.w2_f32, self.b2_f32 = w2, b2

        # Lane-padded (multiple-of-128) parameter copies; weights as bf16 for
        # the MXU, biases stay f32 (added to the f32 accumulator).
        self.f_in, self.hidden, self.f_out = f_in, hidden, f_out
        self.f_in_p = _round_up(f_in, _LANE)
        self.hidden_p = _round_up(hidden, _LANE)
        self.f_out_p = _round_up(f_out, _LANE)
        self.w1_p = _pad2(w1, self.f_in_p, self.hidden_p).astype(jnp.bfloat16)
        self.b1_p = _pad2(b1, 1, self.hidden_p)
        self.w2_p = _pad2(w2, self.hidden_p, self.f_out_p).astype(jnp.bfloat16)
        self.b2_p = _pad2(b2, 1, self.f_out_p)

    def __call__(self, batch):
        x = batch["x"]        # [N, F_in] f32
        a_norm = batch["adj"] # [N, N]   f32 normalized dense adjacency
        n = x.shape[0]

        # Pad the node dim to the tile and cast MXU operands to bf16 once.
        n_p = _round_up(n, _TILE_NODES)
        a_p = _pad2(a_norm, n_p, n_p).astype(jnp.bfloat16)
        x_p = _pad2(x, n_p, self.f_in_p).astype(jnp.bfloat16)

        tm = _TILE_NODES
        tk = _TILE_NODES
        tn1 = 256 if self.hidden_p % 256 == 0 else 128
        tn2 = 256 if self.f_out_p % 256 == 0 else 128

        # Layer 1: H1 = ReLU(A @ (X @ W1) + b1) — kept padded & bf16.
        xw1 = feature_transform(x_p, self.w1_p, tm=tm)
        h1 = aggregate(a_p, xw1, self.b1_p, apply_relu=True,
                       out_dtype=jnp.bfloat16, tm=tm, tk=tk, tn=tn1)

        # Layer 2: Y = A @ (H1 @ W2) + b2 — f32 output.
        xw2 = feature_transform(h1, self.w2_p, tm=tm)
        y_p = aggregate(a_p, xw2, self.b2_p, apply_relu=False,
                        out_dtype=jnp.float32, tm=tm, tk=tk, tn=tn2)

        # Slice padding away.
        return y_p[:n, :self.f_out]


# ----------------------------------------------------------------------------
# GNNWrapper: mirrors the PyTorch forward — unwrap tuple/list, call model.
# ----------------------------------------------------------------------------
class GNNWrapper:
    def __init__(self, model):
        self.model = model

    def __call__(self, batch):
        if isinstance(batch, (tuple, list)):
            batch = batch[0]
        # TODO(synk): Batch.from_data_list (PyG sparse graph-batch collation)
        # has no Pallas equivalent; a pre-collated dense batch dict is assumed.
        return self.model(batch)


# ----------------------------------------------------------------------------
# References (pure JAX) for correctness checking.
# ----------------------------------------------------------------------------
def gcn_ref_f32(a_norm, x, w1, b1, w2, b2):
    h1 = jnp.maximum(a_norm @ (x @ w1) + b1, 0.0)
    return a_norm @ (h1 @ w2) + b2


def gcn_ref_bf16(a_norm, x, w1, b1, w2, b2):
    """Mirrors the kernel's bf16-operand / f32-accumulate numerics."""
    f32 = jnp.float32
    bf = lambda t: t.astype(jnp.bfloat16).astype(f32)
    a16, x16 = bf(a_norm), bf(x)
    w116, w216 = bf(w1), bf(w2)
    xw1 = bf(x16 @ w116)                       # XW stored as bf16
    h1 = bf(jnp.maximum(a16 @ xw1 + b1, 0.0))  # H1 stored as bf16
    xw2 = bf(h1 @ w216)
    return a16 @ xw2 + b2


def build_normalized_adjacency(n):
    """Ring graph + self loops, symmetric normalization D^-1/2 (A+I) D^-1/2."""
    idx = jnp.arange(n)
    a = jnp.zeros((n, n), jnp.float32)
    a = a.at[idx, (idx + 1) % n].set(1.0)
    a = a.at[(idx + 1) % n, idx].set(1.0)
    a = a + jnp.eye(n, dtype=jnp.float32)
    deg = a.sum(axis=1)
    d_inv_sqrt = 1.0 / jnp.sqrt(deg)
    return a * d_inv_sqrt[:, None] * d_inv_sqrt[None, :]


if __name__ == "__main__":
    key = jax.random.PRNGKey(0)
    k_x, k_model = jax.random.split(key)

    # Small synthetic graph: 8 nodes, 16 input features, 32 hidden, 4 classes.
    N, F_IN, HIDDEN, F_OUT = 8, 16, 32, 4

    x = jax.random.normal(k_x, (N, F_IN), jnp.float32)
    a_norm = build_normalized_adjacency(N)

    model = GCNModel(F_IN, HIDDEN, F_OUT, k_model)
    wrapper = GNNWrapper(model)

    # Mirror the PyTorch forward: batch arrives wrapped in a tuple.
    batch = ({"x": x, "adj": a_norm},)
    out = jax.block_until_ready(wrapper(batch))
    assert out.shape == (N, F_OUT), out.shape

    ref16 = gcn_ref_bf16(a_norm, x, model.w1_f32, model.b1_f32,
                         model.w2_f32, model.b2_f32)
    ref32 = gcn_ref_f32(a_norm, x, model.w1_f32, model.b1_f32,
                        model.w2_f32, model.b2_f32)
    err16 = float(jnp.max(jnp.abs(out - ref16)))
    err32 = float(jnp.max(jnp.abs(out - ref32)))
    assert jnp.allclose(out, ref16, atol=1e-2, rtol=1e-2), (
        f"mismatch vs bf16-faithful reference: max abs err = {err16}"
    )
    assert jnp.allclose(out, ref32, atol=1e-1, rtol=1e-1), (
        f"mismatch vs f32 reference: max abs err = {err32}"
    )
    print("KERNEL_OK")
</pallas_src>

<mosaic_0001>
module attributes {stable_mosaic.version = 11 : i64} {
  func.func @_xw_kernel(%arg0: i32, %arg1: memref<256x128xbf16, #tpu.memory_space<vmem>>, %arg2: memref<128x128xbf16, #tpu.memory_space<vmem>>, %arg3: memref<256x128xbf16, #tpu.memory_space<vmem>>) attributes {dimension_semantics = [#tpu.dimension_semantics<parallel>], iteration_bounds = array<i64: 1>, scalar_prefetch = 0 : i64, scratch_operands = 0 : i64, tpu.core_type = #tpu.core_type<tc>, window_params = [{transform_indices = @transform_0, window_bounds = array<i64: 256, 128>}, {pipeline_mode = #tpu.pipeline_mode<synchronous>, transform_indices = @transform_1, window_bounds = array<i64: 128, 128>}, {transform_indices = @transform_2, window_bounds = array<i64: 256, 128>}]} {
    %c0 = arith.constant 0 : index
    %c0_0 = arith.constant 0 : index
    %0 = vector.load %arg1[%c0, %c0_0] : memref<256x128xbf16, #tpu.memory_space<vmem>>, vector<256x128xbf16>
    %c0_1 = arith.constant 0 : index
    %c0_2 = arith.constant 0 : index
    %1 = vector.load %arg2[%c0_1, %c0_2] : memref<128x128xbf16, #tpu.memory_space<vmem>>, vector<128x128xbf16>
    %cst = arith.constant dense<0.000000e+00> : vector<256x128xf32>
    %2 = tpu.matmul %0, %1, %cst {dimension_numbers = #tpu.dot_dimension_numbers<[1], [0], [0], [1], [0, 0, 1, 1], [], []>} : vector<256x128xbf16>, vector<128x128xbf16>, vector<256x128xf32> -> vector<256x128xf32>
    %3 = arith.truncf %2 : vector<256x128xf32> to vector<256x128xbf16>
    %c0_3 = arith.constant 0 : index
    %c0_4 = arith.constant 0 : index
    %4 = vector.load %arg3[%c0_3, %c0_4] : memref<256x128xbf16, #tpu.memory_space<vmem>>, vector<256x128xbf16>
    tpu.vector_store %arg3[%c0_3, %c0_4], %3 {strides = array<i32>} : memref<256x128xbf16, #tpu.memory_space<vmem>>, vector<256x128xbf16>,
    return
  }
  func.func @transform_0(%arg0: i32) -> (i32, i32) {
    %c0_i32 = arith.constant 0 : i32
    %c0_i32_0 = arith.constant 0 : i32
    return %arg0, %c0_i32 : i32, i32
  }
  func.func @transform_1(%arg0: i32) -> (i32, i32) {
    %c0_i32 = arith.constant 0 : i32
    %c0_i32_0 = arith.constant 0 : i32
    %c0_i32_1 = arith.constant 0 : i32
    return %c0_i32, %c0_i32_0 : i32, i32
  }
  func.func @transform_2(%arg0: i32) -> (i32, i32) {
    %c0_i32 = arith.constant 0 : i32
    %c0_i32_0 = arith.constant 0 : i32
    return %arg0, %c0_i32 : i32, i32
  }
}

</mosaic_0001>

<bundles_post_ra>
// kernel: tpu_custom_call.1
= control target key start
LH: loop header
LB: loop body
LE: loop exit
PB: predicated region body
PF: predicated region fallthrough
CT: control target
= control target key end

     0   :  { %7 = vsyncpa [#allocation3], 0  ;;  %s976_s0 = inlined_call_operand.hbm [shape: bf16[256,128], index: 0, kind: input, shape index: {}]   ;;  %s977_s1 = inlined_call_operand.hbm [shape: bf16[128,128], index: 1, kind: input, shape index: {}]   ;;  %s978_s2 = inlined_call_operand.hbm [shape: bf16[256,128], index: 2, kind: output, shape index: {}]  }
   0x1   :  { %8 = vsyncpa [#allocation6], 0 }
   0x2   :  { %9 = vsyncpa [#allocation4], 0  ;;  %s938_s9 = smov [#allocation2]  }
   0x3   :  { %s15_s10 = sshll.u32 %s938_s9, 4  ;;  %s16_s10 = int_to_ptr.vmem [resolvable:$true] %s15_s10 }
   0x4   :  { %s880_s11 = scalar_lea.vmem %s16_s10, 2048  ;;  %p885_p1 = scmp.lt.s32.totalorder %s16_s10, %s16_s10 }
   0x5   :  { %p881_p0 = scmp.ne.s32.totalorder %s16_s10, %s880_s11  ;;  %p886_p2 = scmp.lt.s32.totalorder %s880_s11, %s880_s11 }
   0x7   :  { %p887_p3 = por %p886_p2, %p885_p1 }
   0x9   :  { %p888_p4 = pnand %p887_p3, %p881_p0 }
   0xb   :  { %891 = shalt.err (!%p888_p4)
}
   0xc   :  { %s939_s12 = smov 64   ;;  %s940_s13 = smov 4  }
   0xd   :  { %21 = dma.hbm_to_vmem [thread:$0]  %s976_s0, 2048, %s16_s10, [#allocation3], %s939_s12, %s939_s12, %s940_s13  }
   0xe   :  { %s941_s16 = smov [#allocation5]  }
   0xf   :  { %s27_s17 = sshll.u32 %s941_s16, 4  ;;  %s28_s17 = int_to_ptr.vmem [resolvable:$true] %s27_s17 }
  0x10   :  { %s900_s18 = scalar_lea.vmem %s28_s17, 1024  ;;  %p905_p6 = scmp.lt.s32.totalorder %s28_s17, %s28_s17 }
  0x11   :  { %p901_p5 = scmp.ne.s32.totalorder %s28_s17, %s900_s18  ;;  %p906_p7 = scmp.lt.s32.totalorder %s900_s18, %s900_s18 }
  0x13   :  { %p907_p8 = por %p906_p7, %p905_p6 }
  0x15   :  { %p908_p9 = pnand %p907_p8, %p901_p5 }
  0x17   :  { %911 = shalt.err (!%p908_p9)
}
  0x18   :  { %33 = dma.hbm_to_vmem [thread:$0]  %s977_s1, 1024, %s28_s17, [#allocation6], %s939_s12, %s939_s12, %s940_s13  }
  0x19   :  { %932 = dma.done.wait [#allocation3], 2048  }
  0x1a   :  { %933 = vsyncadd [#allocation3], 4294965248 }
  0x1b   :  { %934 = dma.done.wait [#allocation6], 1024  }
  0x1c   :  { %935 = vsyncadd [#allocation6], 4294966272  ;;  %v848_v0 = vld [vmem:[#allocation5 + $0x38] sm:$0xff]   ;;  %v849_v1 = vld [vmem:[#allocation5 + $0x30] sm:$0xff]   ;;  %s942_s0 = smov [#allocation7]  }
  0x1d   :  { %779 = vmatprep.subr.bf16.mxu0 %v848_v0  ;;  %827 = vmatprep.subr.bf16.mxu1 %v848_v0  ;;  %v850_v2 = vld [vmem:[#allocation5 + $0x28] sm:$0xff]   ;;  %v851_v3 = vld [vmem:[#allocation5 + $0x20] sm:$0xff]   ;;  %v852_v6 = vld [vmem:[#allocation5 + $0x18] sm:$0xff]   ;;  %s559_s1 = sshll.u32 %s942_s0, 4  ;;  %s560_s1 = int_to_ptr.vmem [resolvable:$true] %s559_s1 }
  0x1e   :  { %780 = vmatpush3.bf16.msra.mxu0 %v848_v0  ;;  %835 = vmatpush3.bf16.msra.mxu1 %v848_v0  ;;  %v856_v4 = vld [vmem:[#allocation2] sm:$0xff]   ;;  %v853_v7 = vld [vmem:[#allocation5 + $0x10] sm:$0xff]   ;;  %v854_v8 = vld [vmem:[#allocation5 + $0x8] sm:$0xff]   ;;  %s912_s21 = scalar_lea.vmem %s560_s1, 2048  ;;  %p917_p11 = scmp.lt.s32.totalorder %s560_s1, %s560_s1 }
  0x1f   :  { %781 = vmatprep.subr.bf16.mxu0 %v849_v1  ;;  %828 = vmatprep.subr.bf16.mxu1 %v849_v1  ;;  %v857_v5 = vld [vmem:[#allocation2 + $0x40] sm:$0xff]   ;;  %v858_v10 = vld [vmem:[#allocation2 + $0x8] sm:$0xff]   ;;  %v860_v12 = vld [vmem:[#allocation2 + $0x10] sm:$0xff]   ;;  %p913_p10 = scmp.ne.s32.totalorder %s560_s1, %s912_s21  ;;  %p918_p12 = scmp.lt.s32.totalorder %s912_s21, %s912_s21 }
  0x20   :  { %795 = vmatprep.mubr.bf16.mxu0 %v856_v4  ;;  %811 = vmatprep.mubr.bf16.mxu1 %v857_v5  ;;  %v855_v9 = vld [vmem:[#allocation5] sm:$0xff]   ;;  %v859_v11 = vld [vmem:[#allocation2 + $0x48] sm:$0xff]   ;;  %v861_v13 = vld [vmem:[#allocation2 + $0x50] sm:$0xff]  }
  0x21   :  { %v862_v14 = vld [vmem:[#allocation2 + $0x18] sm:$0xff]   ;;  %v864_v16 = vld [vmem:[#allocation2 + $0x20] sm:$0xff]   ;;  %v866_v18 = vld [vmem:[#allocation2 + $0x28] sm:$0xff]   ;;  %p919_p13 = por %p918_p12, %p917_p11 }
  0x22   :  { %782 = vmatpush3.bf16.msra.mxu0 %v849_v1  ;;  %836 = vmatpush3.bf16.msra.mxu1 %v849_v1  ;;  %v863_v15 = vld [vmem:[#allocation2 + $0x58] sm:$0xff]   ;;  %v865_v17 = vld [vmem:[#allocation2 + $0x60] sm:$0xff]   ;;  %v867_v19 = vld [vmem:[#allocation2 + $0x68] sm:$0xff]  }
  0x23   :  { %783 = vmatprep.subr.bf16.mxu0 %v850_v2  ;;  %829 = vmatprep.subr.bf16.mxu1 %v850_v2  ;;  %v868_v20 = vld [vmem:[#allocation2 + $0x30] sm:$0xff]   ;;  %v870_v22 = vld [vmem:[#allocation2 + $0x38] sm:$0xff]   ;;  %p920_p0 = pnand %p919_p13, %p913_p10 }
  0x24   :  { %v869_v21 = vld [vmem:[#allocation2 + $0x70] sm:$0xff]   ;;  %v871_v23 = vld [vmem:[#allocation2 + $0x78] sm:$0xff]  }
  0x26   :  { %784 = vmatpush3.bf16.msra.mxu0 %v850_v2  ;;  %837 = vmatpush3.bf16.msra.mxu1 %v850_v2 }
  0x27   :  { %785 = vmatprep.subr.bf16.mxu0 %v851_v3  ;;  %830 = vmatprep.subr.bf16.mxu1 %v851_v3 }
  0x2a   :  { %786 = vmatpush3.bf16.msra.mxu0 %v851_v3  ;;  %838 = vmatpush3.bf16.msra.mxu1 %v851_v3 }
  0x2b   :  { %787 = vmatprep.subr.bf16.mxu0 %v852_v6  ;;  %831 = vmatprep.subr.bf16.mxu1 %v852_v6 }
  0x2e   :  { %788 = vmatpush3.bf16.msra.mxu0 %v852_v6  ;;  %839 = vmatpush3.bf16.msra.mxu1 %v852_v6 }
  0x2f   :  { %789 = vmatprep.subr.bf16.mxu0 %v853_v7  ;;  %832 = vmatprep.subr.bf16.mxu1 %v853_v7 }
  0x32   :  { %790 = vmatpush3.bf16.msra.mxu0 %v853_v7  ;;  %840 = vmatpush3.bf16.msra.mxu1 %v853_v7 }
  0x33   :  { %791 = vmatprep.subr.bf16.mxu0 %v854_v8  ;;  %833 = vmatprep.subr.bf16.mxu1 %v854_v8 }
  0x36   :  { %792 = vmatpush3.bf16.msra.mxu0 %v854_v8  ;;  %841 = vmatpush3.bf16.msra.mxu1 %v854_v8 }
  0x37   :  { %793 = vmatprep.subr.bf16.mxu0 %v855_v9  ;;  %834 = vmatprep.subr.bf16.mxu1 %v855_v9 }
  0x3a   :  { %794 = vmatpush3.bf16.msra.mxu0 %v855_v9  ;;  %842 = vmatpush3.bf16.msra.mxu1 %v855_v9 }
  0x3d   :  { %796 = vmatmul.mubr.bf16.vlgmr.msra.gmra.mxu0 %v858_v10  ;;  %812 = vmatmul.mubr.bf16.vlgmr.msra.gmra.mxu1 %v859_v11 }
  0x3e   :  { %799 = vmatprep.mubr.bf16.mxu0 %v860_v12  ;;  %815 = vmatprep.mubr.bf16.mxu1 %v861_v13 }
  0x45   :  { %800 = vmatmul.mubr.bf16.gmra.mxu0 %v862_v14  ;;  %816 = vmatmul.mubr.bf16.gmra.mxu1 %v863_v15 }
  0x46   :  { %803 = vmatprep.mubr.bf16.mxu0 %v864_v16  ;;  %819 = vmatprep.mubr.bf16.mxu1 %v865_v17 }
  0x4d   :  { %804 = vmatmul.mubr.bf16.gmra.mxu0 %v866_v18  ;;  %820 = vmatmul.mubr.bf16.gmra.mxu1 %v867_v19 }
  0x4e   :  { %807 = vmatprep.mubr.bf16.mxu0 %v868_v20  ;;  %823 = vmatprep.mubr.bf16.mxu1 %v869_v21 }
  0x55   :  { %808 = vmatmul.mubr.bf16.gmra.mxu0 %v870_v22  ;;  %824 = vmatmul.mubr.bf16.gmra.mxu1 %v871_v23 }
  0xfd   :  { %v797_v24 = vpop.f32.mrf.mxu0  ;;  %v813_v25 = vpop.f32.mrf.mxu1 }
  0xff   :  { %v267_v26 = vpop.f32.mrf.mxu0  ;;  %v331_v27 = vpop.f32.mrf.mxu1 }
 0x101   :  { %v798_v28 = vpop.f32.mrf.mxu0  ;;  %v814_v29 = vpop.f32.mrf.mxu1 }
 0x102   :  { %v668_v30 = vpack.c.bf16 %v798_v28, %v797_v24  ;;  %v708_v31 = vpack.c.bf16 %v814_v29, %v813_v25 }
 0x103   :  { %v270_v32 = vpop.f32.mrf.mxu0  ;;  %v334_v33 = vpop.f32.mrf.mxu1 }
 0x104   :  { %740 = vst [vmem:[#allocation7 + $0x8] sm:$0xff] %v668_v30   ;;  %748 = vst [vmem:[#allocation7 + $0x48] sm:$0xff] %v708_v31   ;;  %v663_v34 = vpack.c.bf16 %v270_v32, %v267_v26  ;;  %v703_v35 = vpack.c.bf16 %v334_v33, %v331_v27 }
 0x105   :  { %v801_v36 = vpop.f32.mrf.mxu0  ;;  %v817_v37 = vpop.f32.mrf.mxu1 }
 0x106   :  { %664 = vst [vmem:[#allocation7] sm:$0xff] %v663_v34   ;;  %747 = vst [vmem:[#allocation7 + $0x40] sm:$0xff] %v703_v35  }
 0x107   :  { %v283_v38 = vpop.f32.mrf.mxu0  ;;  %v347_v39 = vpop.f32.mrf.mxu1 }
 0x109   :  { %v802_v40 = vpop.f32.mrf.mxu0  ;;  %v818_v41 = vpop.f32.mrf.mxu1 }
 0x10a   :  { %v678_v42 = vpack.c.bf16 %v802_v40, %v801_v36  ;;  %v718_v43 = vpack.c.bf16 %v818_v41, %v817_v37 }
 0x10b   :  { %v286_v44 = vpop.f32.mrf.mxu0  ;;  %v350_v45 = vpop.f32.mrf.mxu1 }
 0x10c   :  { %742 = vst [vmem:[#allocation7 + $0x18] sm:$0xff] %v678_v42   ;;  %750 = vst [vmem:[#allocation7 + $0x58] sm:$0xff] %v718_v43   ;;  %v673_v46 = vpack.c.bf16 %v286_v44, %v283_v38  ;;  %v713_v47 = vpack.c.bf16 %v350_v45, %v347_v39 }
 0x10d   :  { %v805_v48 = vpop.f32.mrf.mxu0  ;;  %v821_v49 = vpop.f32.mrf.mxu1 }
 0x10e   :  { %741 = vst [vmem:[#allocation7 + $0x10] sm:$0xff] %v673_v46   ;;  %749 = vst [vmem:[#allocation7 + $0x50] sm:$0xff] %v713_v47  }
 0x10f   :  { %v299_v50 = vpop.f32.mrf.mxu0  ;;  %v363_v51 = vpop.f32.mrf.mxu1 }
 0x111   :  { %v806_v52 = vpop.f32.mrf.mxu0  ;;  %v822_v53 = vpop.f32.mrf.mxu1 }
 0x112   :  { %v688_v54 = vpack.c.bf16 %v806_v52, %v805_v48  ;;  %v728_v55 = vpack.c.bf16 %v822_v53, %v821_v49 }
 0x113   :  { %v302_v56 = vpop.f32.mrf.mxu0  ;;  %v366_v57 = vpop.f32.mrf.mxu1 }
 0x114   :  { %744 = vst [vmem:[#allocation7 + $0x28] sm:$0xff] %v688_v54   ;;  %752 = vst [vmem:[#allocation7 + $0x68] sm:$0xff] %v728_v55   ;;  %v683_v58 = vpack.c.bf16 %v302_v56, %v299_v50  ;;  %v723_v59 = vpack.c.bf16 %v366_v57, %v363_v51 }
 0x115   :  { %v809_v60 = vpop.f32.mrf.mxu0  ;;  %v825_v61 = vpop.f32.mrf.mxu1 }
 0x116   :  { %743 = vst [vmem:[#allocation7 + $0x20] sm:$0xff] %v683_v58   ;;  %751 = vst [vmem:[#allocation7 + $0x60] sm:$0xff] %v723_v59  }
 0x117   :  { %v315_v62 = vpop.f32.mrf.mxu0  ;;  %v379_v63 = vpop.f32.mrf.mxu1 }
 0x119   :  { %v810_v0 = vpop.f32.mrf.mxu0  ;;  %v826_v1 = vpop.f32.mrf.mxu1 }
 0x11a   :  { %v698_v2 = vpack.c.bf16 %v810_v0, %v809_v60  ;;  %v738_v3 = vpack.c.bf16 %v826_v1, %v825_v61 }
 0x11b   :  { %v318_v4 = vpop.f32.mrf.mxu0  ;;  %v382_v5 = vpop.f32.mrf.mxu1 }
 0x11c   :  { %746 = vst [vmem:[#allocation7 + $0x38] sm:$0xff] %v698_v2   ;;  %754 = vst [vmem:[#allocation7 + $0x78] sm:$0xff] %v738_v3   ;;  %v693_v6 = vpack.c.bf16 %v318_v4, %v315_v62  ;;  %v733_v7 = vpack.c.bf16 %v382_v5, %v379_v63 }
 0x11e   :  { %745 = vst [vmem:[#allocation7 + $0x30] sm:$0xff] %v693_v6   ;;  %753 = vst [vmem:[#allocation7 + $0x70] sm:$0xff] %v733_v7  }
 0x11f   :  { %923 = shalt.err (!%p920_p0)
}
 0x120   :  { %565 = dma.vmem_to_hbm [thread:$0]  %s560_s1, 2048, %s978_s2, [#allocation4], %s939_s12, %s939_s12, %s940_s13  }
 0x121   :  { %936 = dma.done.wait [#allocation4], 2048  }
 0x122   :  { %937 = vsyncadd [#allocation4], 4294965248 }
 0x123   :  { %569 = vsyncpa [#allocation3], 1 }
 0x124   :  { %570 = vsyncpa [#allocation6], 1 }
 0x125   :  { %571 = vsyncpa [#allocation4], 1 }

</bundles_post_ra>
